<compile_context>
chip_gen: v6e
topology: v6e:2x2x1
jax: 0.10.0
libtpu: 0.0.40
codegen_flags: <defaults>
</compile_context>

<pallas_src>
import functools

import jax
import jax.numpy as jnp
from jax.experimental import pallas as pl
from jax.experimental.pallas import tpu as pltpu


def _round_up(a, m):
    return (a + m - 1) // m * m


def _unet3_kernel(x_ref, w_ref, b_ref, o_ref, *, dims, row_off):
    """One batch tile.

    x_ref : [tb, N]      batch-major input tile (no wrapper transpose of x)
    w_ref : [R, max_in]  all four weights stacked on rows (each [out, in])
    b_ref : [R, 1]       all four biases stacked on rows (f32)
    o_ref : [N, tb]      lane-dense output tile (batch on the 128-lane axis)
    """
    N, h0, h1, h2 = dims
    r1, r2, r3, r4 = row_off
    cdt = w_ref.dtype                      # compute dtype for MXU operands

    x = x_ref[...]                         # [tb, N]

    # Static, sublane-aligned slices of the packed slabs (views -> small loads).
    w1 = w_ref[r1:r1 + h0, 0:N]
    w2 = w_ref[r2:r2 + h1, 0:h0]
    w3 = w_ref[r3:r3 + h2, 0:h1]
    w4 = w_ref[r4:r4 + N, 0:h2]
    b1 = b_ref[r1:r1 + h0, :]
    b2 = b_ref[r2:r2 + h1, :]
    b3 = b_ref[r3:r3 + h2, :]
    b4 = b_ref[r4:r4 + N, :]

    # fc1 + ReLU: contract x's feature axis -> [h0, tb]; batch stays on lanes.
    a1 = jax.lax.dot_general(w1, x.astype(cdt), (((1,), (1,)), ((), ())),
                             preferred_element_type=jnp.float32) + b1
    a1 = jnp.maximum(a1, 0.0)              # skip-connection source (f32)

    # fc2 + ReLU
    a2 = jnp.dot(w2, a1.astype(cdt), preferred_element_type=jnp.float32) + b2
    a2 = jnp.maximum(a2, 0.0)

    # fc3 + ReLU
    a3 = jnp.dot(w3, a2.astype(cdt), preferred_element_type=jnp.float32) + b3
    a3 = jnp.maximum(a3, 0.0)

    # fc4 on (h3 + h1) -- skip connection (added in f32), no activation.
    skip = (a3 + a1).astype(cdt)
    y = jnp.dot(w4, skip, preferred_element_type=jnp.float32) + b4
    o_ref[...] = y.astype(o_ref.dtype)     # [N, tb], lane-dense unmasked store


def denoising_unet3(x, params, *, tb=512, compute_dtype=jnp.float32,
                    out_dtype=jnp.float32, return_batch_major=True):
    """x: [B, N].  params: w1..w4 as [out, in], b1..b4 as [out, 1] (or [out]).

    Returns [B, N] (module semantics) or lane-dense [N, B] if
    return_batch_major=False (avoids the output HBM transpose for large B).
    """
    B, N = x.shape
    w1, b1 = params["w1"], params["b1"]
    w2, b2 = params["w2"], params["b2"]
    w3, b3 = params["w3"], params["b3"]
    w4, b4 = params["w4"], params["b4"]

    h0, h1, h2 = w1.shape[0], w2.shape[0], w3.shape[0]
    assert w1.shape == (h0, N) and w2.shape == (h1, h0)
    assert w3.shape == (h2, h1) and w4.shape == (N, h2)
    assert h0 == h2, "skip connection h3 + h1 requires n_units[0] == n_units[2]"

    # --- batch tiling: large, 256-aligned tiles (fewer grid steps, full-width
    #     MXU passes on v6e/v7x, lane-dense stores; also fine on v5e). ---
    tb = _round_up(max(256, min(tb, _round_up(B, 256))), 256)
    B_pad = _round_up(B, tb)
    if B_pad != B:
        x = jnp.pad(x, ((0, B_pad - B), (0, 0)))
    grid = (B_pad // tb,)

    # --- pack 4 weights / 4 biases into two grid-invariant slabs (9 -> 3
    #     input streams).  Row offsets are sublane-aligned so the in-kernel
    #     static slices never straddle a packed sublane. ---
    sub = 8 if jnp.dtype(compute_dtype).itemsize == 4 else 16
    outs = (h0, h1, h2, N)
    ins = (N, h0, h1, h2)
    max_in = max(ins)
    row_off, r = [], 0
    for o in outs:
        row_off.append(r)
        r += _round_up(o, sub)
    R = r

    w_slab = jnp.zeros((R, max_in), compute_dtype)
    b_slab = jnp.zeros((R, 1), jnp.float32)
    for off, w, b, fin in zip(row_off, (w1, w2, w3, w4), (b1, b2, b3, b4), ins):
        w_slab = w_slab.at[off:off + w.shape[0], 0:fin].set(w.astype(compute_dtype))
        b_slab = b_slab.at[off:off + w.shape[0], :].set(
            b.reshape(-1, 1).astype(jnp.float32))

    x_in = x.astype(compute_dtype)

    kernel = functools.partial(_unet3_kernel, dims=(N, h0, h1, h2),
                               row_off=tuple(row_off))

    flops = 2 * B_pad * (N * h0 + h0 * h1 + h1 * h2 + h2 * N)
    bytes_accessed = (x_in.size * x_in.dtype.itemsize
                      + w_slab.size * w_slab.dtype.itemsize
                      + b_slab.size * 4
                      + N * B_pad * jnp.dtype(out_dtype).itemsize)

    grid_spec = pltpu.PrefetchScalarGridSpec(
        num_scalar_prefetch=0,
        grid=grid,
        in_specs=[
            pl.BlockSpec((tb, N), lambda i: (i, 0)),        # x tile, batch-major
            pl.BlockSpec(w_slab.shape, lambda i: (0, 0)),   # resident weight slab
            pl.BlockSpec(b_slab.shape, lambda i: (0, 0)),   # resident bias slab
        ],
        out_specs=pl.BlockSpec((N, tb), lambda i: (0, i)),  # lane-dense output
    )

    out_t = pl.pallas_call(
        kernel,
        out_shape=jax.ShapeDtypeStruct((N, B_pad), out_dtype),
        grid_spec=grid_spec,
        compiler_params=pltpu.CompilerParams(
            dimension_semantics=(("parallel",) if grid[0] > 1
                                 else ("arbitrary",))),
        cost_estimate=pl.CostEstimate(flops=flops, transcendentals=0,
                                      bytes_accessed=bytes_accessed),
    )(x_in, w_slab, b_slab)

    out_t = out_t[:, :B]                   # drop batch padding; [N, B] lane-dense
    if return_batch_major:
        return out_t.T                     # [B, N], matches the PyTorch module
    return out_t


def init_params(key, N, n_units):
    """Deterministic init mimicking nn.Linear (uniform +-1/sqrt(fan_in)).

    Weights in PyTorch's [out, in] shape, biases as [out, 1].
    """
    h0, h1, h2 = n_units
    dims = [(N, h0), (h0, h1), (h1, h2), (h2, N)]
    params = {}
    keys = jax.random.split(key, 2 * len(dims))
    for idx, (fan_in, fan_out) in enumerate(dims):
        bound = 1.0 / jnp.sqrt(fan_in)
        w = jax.random.uniform(keys[2 * idx], (fan_out, fan_in),
                               jnp.float32, -bound, bound)
        b = jax.random.uniform(keys[2 * idx + 1], (fan_out, 1),
                               jnp.float32, -bound, bound)
        params[f"w{idx + 1}"] = w
        params[f"b{idx + 1}"] = b
    return params


def reference_forward(x, params, compute_dtype=jnp.float32):
    """Plain-JAX reference mirroring the kernel's dtype chain (alpha == 0)."""
    relu = lambda v: jnp.maximum(v, 0.0)

    def lin(a, w, b):
        return jnp.dot(a.astype(compute_dtype), w.astype(compute_dtype).T,
                       preferred_element_type=jnp.float32) + b.reshape(1, -1)

    h1 = relu(lin(x, params["w1"], params["b1"]))
    h2 = relu(lin(h1, params["w2"], params["b2"]))
    h3 = relu(lin(h2, params["w3"], params["b3"]))
    return lin(h3 + h1, params["w4"], params["b4"])


if __name__ == "__main__":
    # Module config: N=16 features, n_units=[32, 64, 32], act="ReLU", alpha=0.
    N = 16
    n_units = (32, 64, 32)   # n_units[0] must equal n_units[2] for the skip add
    B = 1024                 # batch; tiles are fat and 256-aligned
    TB = 512                 # batch tile -> grid=(2,), one tile per v7x core

    key = jax.random.PRNGKey(0)
    k_x, k_p = jax.random.split(key)
    x = jax.random.normal(k_x, (B, N), jnp.float32)
    params = init_params(k_p, N, n_units)

    out = denoising_unet3(x, params, tb=TB, compute_dtype=jnp.float32)
    out = jax.block_until_ready(out)

    ref = reference_forward(x, params, compute_dtype=jnp.float32)
    assert out.shape == (B, N)
    assert out.dtype == jnp.float32
    max_err = float(jnp.max(jnp.abs(out - ref)))
    assert jnp.allclose(out, ref, atol=1e-4, rtol=1e-4), (
        f"mismatch vs reference (max abs err {max_err})")

    print("KERNEL_OK")
</pallas_src>

<mosaic_0001>
module attributes {stable_mosaic.version = 11 : i64} {
  func.func @_unet3_kernel(%arg0: i32, %arg1: memref<512x16xf32, #tpu.memory_space<vmem>>, %arg2: memref<144x64xf32, #tpu.memory_space<vmem>>, %arg3: memref<144x1xf32, #tpu.memory_space<vmem>>, %arg4: memref<16x512xf32, #tpu.memory_space<vmem>>) attributes {dimension_semantics = [#tpu.dimension_semantics<parallel>], iteration_bounds = array<i64: 2>, scalar_prefetch = 0 : i64, scratch_operands = 0 : i64, tpu.core_type = #tpu.core_type<tc>, window_params = [{transform_indices = @transform_0, window_bounds = array<i64: 512, 16>}, {pipeline_mode = #tpu.pipeline_mode<synchronous>, transform_indices = @transform_1, window_bounds = array<i64: 144, 64>}, {pipeline_mode = #tpu.pipeline_mode<synchronous>, transform_indices = @transform_2, window_bounds = array<i64: 144, 1>}, {transform_indices = @transform_3, window_bounds = array<i64: 16, 512>}]} {
    %c0 = arith.constant 0 : index
    %c0_0 = arith.constant 0 : index
    %0 = vector.load %arg1[%c0, %c0_0] : memref<512x16xf32, #tpu.memory_space<vmem>>, vector<512x16xf32>
    %c0_1 = arith.constant 0 : index
    %c0_2 = arith.constant 0 : index
    %1 = vector.load %arg2[%c0_1, %c0_2] : memref<144x64xf32, #tpu.memory_space<vmem>>, vector<32x16xf32>
    %c32 = arith.constant 32 : index
    %c0_3 = arith.constant 0 : index
    %2 = vector.load %arg2[%c32, %c0_3] : memref<144x64xf32, #tpu.memory_space<vmem>>, vector<64x32xf32>
    %c96 = arith.constant 96 : index
    %c0_4 = arith.constant 0 : index
    %3 = vector.load %arg2[%c96, %c0_4] : memref<144x64xf32, #tpu.memory_space<vmem>>, vector<32x64xf32>
    %c128 = arith.constant 128 : index
    %c0_5 = arith.constant 0 : index
    %4 = vector.load %arg2[%c128, %c0_5] : memref<144x64xf32, #tpu.memory_space<vmem>>, vector<16x32xf32>
    %c0_6 = arith.constant 0 : index
    %c0_7 = arith.constant 0 : index
    %5 = vector.load %arg3[%c0_6, %c0_7] : memref<144x1xf32, #tpu.memory_space<vmem>>, vector<32x1xf32>
    %c32_8 = arith.constant 32 : index
    %c0_9 = arith.constant 0 : index
    %6 = vector.load %arg3[%c32_8, %c0_9] : memref<144x1xf32, #tpu.memory_space<vmem>>, vector<64x1xf32>
    %c96_10 = arith.constant 96 : index
    %c0_11 = arith.constant 0 : index
    %7 = vector.load %arg3[%c96_10, %c0_11] : memref<144x1xf32, #tpu.memory_space<vmem>>, vector<32x1xf32>
    %c128_12 = arith.constant 128 : index
    %c0_13 = arith.constant 0 : index
    %8 = vector.load %arg3[%c128_12, %c0_13] : memref<144x1xf32, #tpu.memory_space<vmem>>, vector<16x1xf32>
    %cst = arith.constant dense<0.000000e+00> : vector<32x512xf32>
    %9 = tpu.matmul %1, %0, %cst {dimension_numbers = #tpu.dot_dimension_numbers<[1], [1], [0], [0], [0, 0, 1, 0], [], []>} : vector<32x16xf32>, vector<512x16xf32>, vector<32x512xf32> -> vector<32x512xf32>
    %10 = vector.broadcast %5 : vector<32x1xf32> to vector<32x512xf32>
    %11 = arith.addf %9, %10 : vector<32x512xf32>
    %cst_14 = arith.constant 0.000000e+00 : f32
    %12 = vector.broadcast %cst_14 : f32 to vector<32x512xf32>
    %13 = arith.maximumf %11, %12 : vector<32x512xf32>
    %cst_15 = arith.constant dense<0.000000e+00> : vector<64x512xf32>
    %14 = tpu.matmul %2, %13, %cst_15 {dimension_numbers = #tpu.dot_dimension_numbers<[1], [0], [0], [1], [0, 0, 1, 1], [], []>} : vector<64x32xf32>, vector<32x512xf32>, vector<64x512xf32> -> vector<64x512xf32>
    %15 = vector.broadcast %6 : vector<64x1xf32> to vector<64x512xf32>
    %16 = arith.addf %14, %15 : vector<64x512xf32>
    %cst_16 = arith.constant 0.000000e+00 : f32
    %17 = vector.broadcast %cst_16 : f32 to vector<64x512xf32>
    %18 = arith.maximumf %16, %17 : vector<64x512xf32>
    %cst_17 = arith.constant dense<0.000000e+00> : vector<32x512xf32>
    %19 = tpu.matmul %3, %18, %cst_17 {dimension_numbers = #tpu.dot_dimension_numbers<[1], [0], [0], [1], [0, 0, 1, 1], [], []>} : vector<32x64xf32>, vector<64x512xf32>, vector<32x512xf32> -> vector<32x512xf32>
    %20 = vector.broadcast %7 : vector<32x1xf32> to vector<32x512xf32>
    %21 = arith.addf %19, %20 : vector<32x512xf32>
    %cst_18 = arith.constant 0.000000e+00 : f32
    %22 = vector.broadcast %cst_18 : f32 to vector<32x512xf32>
    %23 = arith.maximumf %21, %22 : vector<32x512xf32>
    %24 = arith.addf %23, %13 : vector<32x512xf32>
    %cst_19 = arith.constant dense<0.000000e+00> : vector<16x512xf32>
    %25 = tpu.matmul %4, %24, %cst_19 {dimension_numbers = #tpu.dot_dimension_numbers<[1], [0], [0], [1], [0, 0, 1, 1], [], []>} : vector<16x32xf32>, vector<32x512xf32>, vector<16x512xf32> -> vector<16x512xf32>
    %26 = vector.broadcast %8 : vector<16x1xf32> to vector<16x512xf32>
    %27 = arith.addf %25, %26 : vector<16x512xf32>
    %c0_20 = arith.constant 0 : index
    %c0_21 = arith.constant 0 : index
    %28 = vector.load %arg4[%c0_20, %c0_21] : memref<16x512xf32, #tpu.memory_space<vmem>>, vector<16x512xf32>
    tpu.vector_store %arg4[%c0_20, %c0_21], %27 {strides = array<i32>} : memref<16x512xf32, #tpu.memory_space<vmem>>, vector<16x512xf32>,
    return
  }
  func.func @transform_0(%arg0: i32) -> (i32, i32) {
    %c0_i32 = arith.constant 0 : i32
    %c0_i32_0 = arith.constant 0 : i32
    return %arg0, %c0_i32 : i32, i32
  }
  func.func @transform_1(%arg0: i32) -> (i32, i32) {
    %c0_i32 = arith.constant 0 : i32
    %c0_i32_0 = arith.constant 0 : i32
    %c0_i32_1 = arith.constant 0 : i32
    return %c0_i32, %c0_i32_0 : i32, i32
  }
  func.func @transform_2(%arg0: i32) -> (i32, i32) {
    %c0_i32 = arith.constant 0 : i32
    %c0_i32_0 = arith.constant 0 : i32
    %c0_i32_1 = arith.constant 0 : i32
    return %c0_i32, %c0_i32_0 : i32, i32
  }
  func.func @transform_3(%arg0: i32) -> (i32, i32) {
    %c0_i32 = arith.constant 0 : i32
    %c0_i32_0 = arith.constant 0 : i32
    return %c0_i32, %arg0 : i32, i32
  }
}

</mosaic_0001>

<bundles_post_ra>
// kernel: tpu_custom_call.1
= control target key start
LH: loop header
LB: loop body
LE: loop exit
PB: predicated region body
PF: predicated region fallthrough
CT: control target
= control target key end

     0   :  { %8 = vsyncpa [#allocation3], 0  ;;  %s2407_s0 = inlined_call_operand.vmem [shape: f32[1024,16], index: 0, kind: input, shape index: {}]   ;;  %s2408_s1 = inlined_call_operand.vmem [shape: f32[144,64], index: 1, kind: input, shape index: {}]   ;;  %s2409_s2 = inlined_call_operand.vmem [shape: f32[144,1], index: 2, kind: input, shape index: {}]   ;;  %s2410_s3 = inlined_call_operand.hbm [shape: f32[16,1024], index: 3, kind: output, shape index: {}]  }
   0x1   :  { %10 = vsyncpa [#allocation3 + $0x1], 0  ;;  %s1838_s12 = smov 0   ;;  %s1840_s13 = smov 0  }
   0x2   :  { %s1842_s14 = smov 0   ;;  %s1844_s15 = smov 0  }
   0x3 LB: > { %s1859_s16 = sadd.s32 4294967295, %s1810_s15   ;;  %s1511_s17 = sadd.s32 4294967294, %s1810_s15   ;;  %s1810_s15 = sphi %s1844_s15, %s2472_s15   ;;  %s1806_s14 = sphi %s1842_s14, %s2471_s14   ;;  %s1802_s13 = sphi %s1840_s13, %s2470_s13   ;;  %s1798_s12 = sphi %s1838_s12, %s2469_s12  }
   0x4   : > { %s1863_s18 = sadd.s32 1, %s1810_s15   ;;  %s91_s19 = sadd.s32 1, %s1806_s14 }
   0x5   : > { %s88_s20 = ssub.s32 %s1810_s15, %s1863_s18  ;;  %p101_p0 = scmp.ne.s32.totalorder %s1806_s14, %s1802_s13 }
   0x6   : > { %p89_p1 = scmp.eq.s32.totalorder %s88_s20, 0  ;;  %p102_p2 = scmp.eq.s32.totalorder %s1859_s16, 1 }
   0x7   : > { %p107_p3 = scmp.ne.s32.totalorder %s1802_s13, %s1798_s12  ;;  %p108_p4 = scmp.eq.s32.totalorder %s1511_s17, 1 }
   0x8   : > { %s1874_s21 = scalar_select %p89_p1, %s1806_s14, %s91_s19  }
   0x9   : > { %p1876_p5 = por %p102_p2, %p101_p0  ;;  %p1880_p6 = por %p108_p4, %p107_p3 }
   0xa   : > { %p1514_p7 = scmp.ge.s32.totalorder %s1810_s15, 1  ;;  %p141_p8 = scmp.lt.s32.totalorder %s1810_s15, 3 }
   0xc   : > { %p142_p9 = pnand %p1514_p7, %p141_p8 }
   0xe   : > { %145 = sbr.rel (%p142_p9) target bundleno = 991 (0x3df), region = 32 }
  0x13   : > { %s1516_s24 = sshll.u32 %s1859_s16, 6  ;;  %vm292_vm0 = vcmask 130048   ;;  %v1890_v0 = vld [vmem:[%s2408_s1] sm:$0xff]  ;;  %v257_v1 = vld [vmem:[%s2409_s2 + $0x18] sm:$0xff]  ;;  %v1812_v2 = vmov 0   ;;  %v255_v3 = vld [vmem:[%s2409_s2 + $0x8] sm:$0xff] }
  0x14   : > { %p166_p10 = scmp.lt.s32.totalorder %s1516_s24, 127  ;;  %1656 = vmatprep.mubr.msk.f32.mxu0 %vm292_vm0, %v1890_v0  ;;  %1696 = vmatprep.mubr.msk.f32.mxu1 %vm292_vm0, %v1890_v0  ;;  %v256_v4 = vld [vmem:[%s2409_s2 + $0x10] sm:$0xff]  ;;  %v254_v5 = vld [vmem:[%s2409_s2] sm:$0xff]  ;;  %v265_v6 = vld [vmem:[%s2409_s2 + $0x58] sm:$0xff]  ;;  %vm731_vm1 = vcmask 261120   ;;  %vm1034_vm2 = vcmask 523264  }
  0x15   : > { %1748 = vset.pattern.permute.xlu0 %v1812_v2  ;;  %1749 = vset.pattern.permute.xlu1 %v1812_v2  ;;  %v264_v7 = vld [vmem:[%s2409_s2 + $0x50] sm:$0xff]  ;;  %v263_v18 = vld [vmem:[%s2409_s2 + $0x48] sm:$0xff]  ;;  %v262_v19 = vld [vmem:[%s2409_s2 + $0x40] sm:$0xff]  ;;  %s162_s30 = sand.u32 1, %s1802_s13   ;;  %s1623_s7 = sshll.u32 %s1859_s16, 9 }
  0x16   : > { %s2474_s24 = smov (!%p166_p10, %s1516_s24), 127  ;;  %289 = vperm.xlu0 %1748, %v257_v1   ;;  %279 = vperm.xlu1 %1749, %v255_v3   ;;  %v261_v24 = vld [vmem:[%s2409_s2 + $0x38] sm:$0xff]  ;;  %v260_v25 = vld [vmem:[%s2409_s2 + $0x30] sm:$0xff]  ;;  %v259_v30 = vld [vmem:[%s2409_s2 + $0x28] sm:$0xff]  ;;  %s1515_s4 = sshll.u32 %s162_s30, 6 }
  0x17   : > { %s1517_s8 = sshll.u32 %s2474_s24, 3  ;;  %v258_v31 = vld [vmem:[%s2409_s2 + $0x20] sm:$0xff]  ;;  %v269_v36 = vld [vmem:[%s2409_s2 + $0x78] sm:$0xff]  ;;  %v268_v37 = vld [vmem:[%s2409_s2 + $0x70] sm:$0xff]  ;;  %s164_s5 = scalar_lea.vmem [#allocation2], %s1515_s4 }
  0x18   : > { %s1911_s11 = scalar_lea.vmem %s2407_s0, %s1517_s8  ;;  %v267_v42 = vld [vmem:[%s2409_s2 + $0x68] sm:$0xff]  ;;  %v266_v43 = vld [vmem:[%s2409_s2 + $0x60] sm:$0xff]  ;;  %s1449_s6 = sshll.u32 %s164_s5, 4  ;;  %s2358_s6 = int_to_ptr.vmem [resolvable:$true] %s1449_s6 }
  0x19   : > { %v203_v8 = vld [vmem:[%s1911_s11 + $0xf8] sm:$0xff]  ;;  %v202_v12 = vld [vmem:[%s1911_s11 + $0xf0] sm:$0xff]  ;;  %v201_v16 = vld [vmem:[%s1911_s11 + $0xe8] sm:$0xff]  ;;  %s2363_s9 = scalar_lea.hbm %s2410_s3, %s1623_s7  ;;  %s2367_s16 = scalar_lea.sflag [#allocation3], %s162_s30 }
  0x1a   : > { %v235_v9 = vld [vmem:[%s1911_s11 + $0x1f8] sm:$0xff]  ;;  %284 = vperm.xlu0 %1748, %v256_v4   ;;  %274 = vperm.xlu1 %1749, %v254_v5   ;;  %v234_v13 = vld [vmem:[%s1911_s11 + $0x1f0] sm:$0xff]  ;;  %v233_v17 = vld [vmem:[%s1911_s11 + $0x1e8] sm:$0xff]  ;;  %s1750_s10 = scalar_lea.vmem %s2358_s6, 1024  ;;  %s1814_s17 = smov [#allocation2]  }
  0x1b   : > { %v187_v10 = vld [vmem:[%s1911_s11 + $0x78] sm:$0xff]  ;;  %1624 = vmatprep.subr.msk.mxu0 %vm292_vm0, %v203_v8  ;;  %1664 = vmatprep.subr.msk.mxu1 %vm292_vm0, %v235_v9  ;;  %v186_v14 = vld [vmem:[%s1911_s11 + $0x70] sm:$0xff]  ;;  %v185_v20 = vld [vmem:[%s1911_s11 + $0x68] sm:$0xff]  ;;  %p1751_p11 = scmp.ne.s32.totalorder %s2358_s6, %s1750_s10  ;;  %s1754_s19 = sshll.u32 %s1814_s17, 4  ;;  %s1755_s19 = int_to_ptr.vmem [resolvable:$false] %s1754_s19 }
  0x1c   : > { %v219_v11 = vld [vmem:[%s1911_s11 + $0x178] sm:$0xff]  ;;  %1625 = vmatpush3.xpose.msk.msra.mxu0 %vm292_vm0, %v187_v10  ;;  %v218_v15 = vld [vmem:[%s1911_s11 + $0x170] sm:$0xff]  ;;  %v217_v21 = vld [vmem:[%s1911_s11 + $0x168] sm:$0xff]  ;;  %s1756_s20 = scalar_lea.vmem %s1755_s19, 2048  ;;  %p1757_p0 = scmp.lt.s32.totalorder %s2358_s6, %s1755_s19 }
  0x1d   : > { %1665 = vmatpush3.xpose.msk.msra.mxu1 %vm292_vm0, %v219_v11  ;;  %1626 = vmatprep.subr.msk.mxu0 %vm292_vm0, %v202_v12  ;;  %v200_v22 = vld [vmem:[%s1911_s11 + $0xe0] sm:$0xff]  ;;  %v199_v28 = vld [vmem:[%s1911_s11 + $0xd8] sm:$0xff]  ;;  %v198_v34 = vld [vmem:[%s1911_s11 + $0xd0] sm:$0xff]  ;;  %p1752_p12 = pnand %p1751_p11, %p1876_p5  ;;  %p1758_p1 = scmp.lt.s32.totalorder %s1756_s20, %s1750_s10 }
  0x1e   : > { %1666 = vmatprep.subr.msk.mxu1 %vm292_vm0, %v234_v13  ;;  %728 = vperm.xlu0 %1748, %v265_v6   ;;  %v232_v23 = vld [vmem:[%s1911_s11 + $0x1e0] sm:$0xff]  ;;  %v231_v29 = vld [vmem:[%s1911_s11 + $0x1d8] sm:$0xff]  ;;  %v230_v35 = vld [vmem:[%s1911_s11 + $0x1d0] sm:$0xff] }
  0x1f   : > { %723 = vperm.xlu1 %1749, %v264_v7   ;;  %v184_v26 = vld [vmem:[%s1911_s11 + $0x60] sm:$0xff]  ;;  %v183_v32 = vld [vmem:[%s1911_s11 + $0x58] sm:$0xff]  ;;  %v182_v38 = vld [vmem:[%s1911_s11 + $0x50] sm:$0xff]  ;;  %p1753_p13 = pneg %p1752_p12  ;;  %p1759_p2 = por %p1758_p1, %p1757_p0 }
  0x20   : > { %1627 = vmatpush3.xpose.msk.msra.mxu0 %vm292_vm0, %v186_v14  ;;  %v216_v27 = vld [vmem:[%s1911_s11 + $0x160] sm:$0xff]  ;;  %v215_v33 = vld [vmem:[%s1911_s11 + $0x158] sm:$0xff]  ;;  %v214_v39 = vld [vmem:[%s1911_s11 + $0x150] sm:$0xff] }
  0x21   : > { %1667 = vmatpush3.xpose.msk.msra.mxu1 %vm292_vm0, %v218_v15  ;;  %1628 = vmatprep.subr.msk.mxu0 %vm292_vm0, %v201_v16  ;;  %v197_v40 = vld [vmem:[%s1911_s11 + $0xc8] sm:$0xff]  ;;  %v196_v46 = vld [vmem:[%s1911_s11 + $0xc0] sm:$0xff]  ;;  %v195_v52 = vld [vmem:[%s1911_s11 + $0xb8] sm:$0xff]  ;;  %p1760_p3 = pnand %p1759_p2, %p1753_p13 }
  0x22   : > { %1668 = vmatprep.subr.msk.mxu1 %vm292_vm0, %v233_v17  ;;  %718 = vperm.xlu0 %1748, %v263_v18   ;;  %v229_v41 = vld [vmem:[%s1911_s11 + $0x1c8] sm:$0xff]  ;;  %v228_v47 = vld [vmem:[%s1911_s11 + $0x1c0] sm:$0xff]  ;;  %v227_v53 = vld [vmem:[%s1911_s11 + $0x1b8] sm:$0xff] }
  0x23   : > { %713 = vperm.xlu1 %1749, %v262_v19   ;;  %v181_v44 = vld [vmem:[%s1911_s11 + $0x48] sm:$0xff]  ;;  %v270_v48 = vld [vmem:[%s2409_s2 + $0x80] sm:$0xff]  ;;  %v179_v54 = vld [vmem:[%s1911_s11 + $0x38] sm:$0xff] }
  0x24   : > { %1629 = vmatpush3.xpose.msk.msra.mxu0 %vm292_vm0, %v185_v20  ;;  %v213_v45 = vld [vmem:[%s1911_s11 + $0x148] sm:$0xff]  ;;  %v180_v50 = vld [vmem:[%s1911_s11 + $0x40] sm:$0xff]  ;;  %v211_v55 = vld [vmem:[%s1911_s11 + $0x138] sm:$0xff] }
  0x25   : > { %1669 = vmatpush3.xpose.msk.msra.mxu1 %vm292_vm0, %v217_v21  ;;  %1630 = vmatprep.subr.msk.mxu0 %vm292_vm0, %v200_v22  ;;  %v271_v49 = vld [vmem:[%s2409_s2 + $0x88] sm:$0xff]  ;;  %v212_v51 = vld [vmem:[%s1911_s11 + $0x140] sm:$0xff]  ;;  %v194_v56 = vld [vmem:[%s1911_s11 + $0xb0] sm:$0xff] }
  0x26   : > { %1670 = vmatprep.subr.msk.mxu1 %vm292_vm0, %v232_v23  ;;  %708 = vperm.xlu0 %1748, %v261_v24   ;;  %v226_v57 = vld [vmem:[%s1911_s11 + $0x1b0] sm:$0xff]  ;;  %v193_v60 = vld [vmem:[%s1911_s11 + $0xa8] sm:$0xff]  ;;  %v192_v1 = vld [vmem:[%s1911_s11 + $0xa0] sm:$0xff]  ;;  %v2427_v23 = vmov 0.0  }
  0x27   : > { %703 = vperm.xlu1 %1749, %v260_v25   ;;  %v178_v58 = vld [vmem:[%s1911_s11 + $0x30] sm:$0xff]  ;;  %v225_v61 = vld [vmem:[%s1911_s11 + $0x1a8] sm:$0xff]  ;;  %v224_v2 = vld [vmem:[%s1911_s11 + $0x1a0] sm:$0xff] }
  0x28   : > { %1631 = vmatpush3.xpose.msk.msra.mxu0 %vm292_vm0, %v184_v26  ;;  %v210_v59 = vld [vmem:[%s1911_s11 + $0x130] sm:$0xff]  ;;  %v177_v62 = vld [vmem:[%s1911_s11 + $0x28] sm:$0xff]  ;;  %v176_v3 = vld [vmem:[%s1911_s11 + $0x20] sm:$0xff] }
  0x29   : > { %1671 = vmatpush3.xpose.msk.msra.mxu1 %vm292_vm0, %v216_v27  ;;  %1632 = vmatprep.subr.msk.mxu0 %vm292_vm0, %v199_v28  ;;  %v209_v63 = vld [vmem:[%s1911_s11 + $0x128] sm:$0xff]  ;;  %v208_v4 = vld [vmem:[%s1911_s11 + $0x120] sm:$0xff]  ;;  %v191_v5 = vld [vmem:[%s1911_s11 + $0x98] sm:$0xff] }
  0x2a   : > { %1672 = vmatprep.subr.msk.mxu1 %vm292_vm0, %v231_v29  ;;  %698 = vperm.xlu0 %1748, %v259_v30   ;;  %v223_v6 = vld [vmem:[%s1911_s11 + $0x198] sm:$0xff]  ;;  %v190_v9 = vld [vmem:[%s1911_s11 + $0x90] sm:$0xff]  ;;  %v189_v13 = vld [vmem:[%s1911_s11 + $0x88] sm:$0xff] }
  0x2b   : > { %693 = vperm.xlu1 %1749, %v258_v31   ;;  %v175_v7 = vld [vmem:[%s1911_s11 + $0x18] sm:$0xff]  ;;  %v222_v10 = vld [vmem:[%s1911_s11 + $0x190] sm:$0xff]  ;;  %v221_v14 = vld [vmem:[%s1911_s11 + $0x188] sm:$0xff] }
  0x2c   : > { %1633 = vmatpush3.xpose.msk.msra.mxu0 %vm292_vm0, %v183_v32  ;;  %v207_v8 = vld [vmem:[%s1911_s11 + $0x118] sm:$0xff]  ;;  %v174_v11 = vld [vmem:[%s1911_s11 + $0x10] sm:$0xff]  ;;  %v173_v15 = vld [vmem:[%s1911_s11 + $0x8] sm:$0xff] }
  0x2d   : > { %1673 = vmatpush3.xpose.msk.msra.mxu1 %vm292_vm0, %v215_v33  ;;  %1634 = vmatprep.subr.msk.mxu0 %vm292_vm0, %v198_v34  ;;  %v206_v12 = vld [vmem:[%s1911_s11 + $0x110] sm:$0xff]  ;;  %v205_v16 = vld [vmem:[%s1911_s11 + $0x108] sm:$0xff]  ;;  %v188_v17 = vld [vmem:[%s1911_s11 + $0x80] sm:$0xff] }
  0x2e   : > { %1674 = vmatprep.subr.msk.mxu1 %vm292_vm0, %v230_v35  ;;  %1031 = vperm.xlu0 %1748, %v269_v36   ;;  %v220_v18 = vld [vmem:[%s1911_s11 + $0x180] sm:$0xff]  ;;  %v237_v21 = vld [vmem:[%s2408_s1 + $0x8] sm:$0xff]  ;;  %v238_v22 = vld [vmem:[%s2408_s1 + $0x10] sm:$0xff] }
  0x2f   : > { %1026 = vperm.xlu1 %1749, %v268_v37   ;;  %v172_v19 = vld [vmem:[%s1911_s11] sm:$0xff] }
  0x30   : > { %1635 = vmatpush3.xpose.msk.msra.mxu0 %vm292_vm0, %v182_v38  ;;  %v204_v20 = vld [vmem:[%s1911_s11 + $0x100] sm:$0xff] }
  0x31   : > { %1675 = vmatpush3.xpose.msk.msra.mxu1 %vm292_vm0, %v214_v39  ;;  %1636 = vmatprep.subr.msk.mxu0 %vm292_vm0, %v197_v40 }
  0x32   : > { %1676 = vmatprep.subr.msk.mxu1 %vm292_vm0, %v229_v41  ;;  %1021 = vperm.xlu0 %1748, %v267_v42  }
  0x33   : > { %1016 = vperm.xlu1 %1749, %v266_v43  }
  0x34   : > { %1637 = vmatpush3.xpose.msk.msra.mxu0 %vm292_vm0, %v181_v44 }
  0x35   : > { %1677 = vmatpush3.xpose.msk.msra.mxu1 %vm292_vm0, %v213_v45  ;;  %1638 = vmatprep.subr.msk.mxu0 %vm292_vm0, %v196_v46 }
  0x36   : > { %1678 = vmatprep.subr.msk.mxu1 %vm292_vm0, %v228_v47  ;;  %1259 = vperm.xlu0 %1748, %v270_v48  }
  0x37   : > { %1264 = vperm.xlu1 %1749, %v271_v49  }
  0x38   : > { %1639 = vmatpush3.xpose.msk.msra.mxu0 %vm292_vm0, %v180_v50 }
  0x39   : > { %1679 = vmatpush3.xpose.msk.msra.mxu1 %vm292_vm0, %v212_v51  ;;  %1640 = vmatprep.subr.msk.mxu0 %vm292_vm0, %v195_v52 }
  0x3a   : > { %1680 = vmatprep.subr.msk.mxu1 %vm292_vm0, %v227_v53 }
  0x3c   : > { %1641 = vmatpush3.xpose.msk.msra.mxu0 %vm292_vm0, %v179_v54 }
  0x3d   : > { %1681 = vmatpush3.xpose.msk.msra.mxu1 %vm292_vm0, %v211_v55  ;;  %1642 = vmatprep.subr.msk.mxu0 %vm292_vm0, %v194_v56 }
  0x3e   : > { %1682 = vmatprep.subr.msk.mxu1 %vm292_vm0, %v226_v57 }
  0x40   : > { %1643 = vmatpush3.xpose.msk.msra.mxu0 %vm292_vm0, %v178_v58 }
  0x41   : > { %1683 = vmatpush3.xpose.msk.msra.mxu1 %vm292_vm0, %v210_v59  ;;  %1644 = vmatprep.subr.msk.mxu0 %vm292_vm0, %v193_v60 }
  0x42   : > { %1684 = vmatprep.subr.msk.mxu1 %vm292_vm0, %v225_v61 }
  0x44   : > { %1645 = vmatpush3.xpose.msk.msra.mxu0 %vm292_vm0, %v177_v62 }
  0x45   : > { %1685 = vmatpush3.xpose.msk.msra.mxu1 %vm292_vm0, %v209_v63  ;;  %1646 = vmatprep.subr.msk.mxu0 %vm292_vm0, %v192_v1 }
  0x46   : > { %1686 = vmatprep.subr.msk.mxu1 %vm292_vm0, %v224_v2 }
  0x48   : > { %1647 = vmatpush3.xpose.msk.msra.mxu0 %vm292_vm0, %v176_v3 }
  0x49   : > { %1687 = vmatpush3.xpose.msk.msra.mxu1 %vm292_vm0, %v208_v4  ;;  %1648 = vmatprep.subr.msk.mxu0 %vm292_vm0, %v191_v5 }
  0x4a   : > { %1688 = vmatprep.subr.msk.mxu1 %vm292_vm0, %v223_v6 }
  0x4c   : > { %1649 = vmatpush3.xpose.msk.msra.mxu0 %vm292_vm0, %v175_v7 }
  0x4d   : > { %1689 = vmatpush3.xpose.msk.msra.mxu1 %vm292_vm0, %v207_v8  ;;  %1650 = vmatprep.subr.msk.mxu0 %vm292_vm0, %v190_v9 }
  0x4e   : > { %1690 = vmatprep.subr.msk.mxu1 %vm292_vm0, %v222_v10 }
  0x50   : > { %1651 = vmatpush3.xpose.msk.msra.mxu0 %vm292_vm0, %v174_v11 }
  0x51   : > { %1691 = vmatpush3.xpose.msk.msra.mxu1 %vm292_vm0, %v206_v12  ;;  %1652 = vmatprep.subr.msk.mxu0 %vm292_vm0, %v189_v13  ;;  %v240_v13 = vld [vmem:[%s2408_s1 + $0x20] sm:$0xff] }
  0x52   : > { %1692 = vmatprep.subr.msk.mxu1 %vm292_vm0, %v221_v14  ;;  %v241_v14 = vld [vmem:[%s2408_s1 + $0x28] sm:$0xff] }
  0x54   : > { %1653 = vmatpush3.xpose.msk.msra.mxu0 %vm292_vm0, %v173_v15  ;;  %v242_v15 = vld [vmem:[%s2408_s1 + $0x30] sm:$0xff] }
  0x55   : > { %1693 = vmatpush3.xpose.msk.msra.mxu1 %vm292_vm0, %v205_v16  ;;  %1654 = vmatprep.subr.msk.mxu0 %vm292_vm0, %v188_v17  ;;  %v243_v16 = vld [vmem:[%s2408_s1 + $0x38] sm:$0xff]  ;;  %v244_v17 = vld [vmem:[%s2408_s1 + $0x40] sm:$0xff] }
  0x56   : > { %1694 = vmatprep.subr.msk.mxu1 %vm292_vm0, %v220_v18  ;;  %v245_v18 = vld [vmem:[%s2408_s1 + $0x48] sm:$0xff] }
  0x58   : > { %1655 = vmatpush3.xpose.msk.msra.mxu0 %vm292_vm0, %v172_v19  ;;  %v246_v19 = vld [vmem:[%s2408_s1 + $0x50] sm:$0xff] }
  0x59   : > { %1695 = vmatpush3.xpose.msk.msra.mxu1 %vm292_vm0, %v204_v20  ;;  %v247_v20 = vld [vmem:[%s2408_s1 + $0x58] sm:$0xff] }
  0x5b   : > { %1657 = vmatmul.mubr.msk.f32.vlgmr.msra.gmra.mxu0 %vm292_vm0, %v1890_v0 }
  0x5c   : > { %1697 = vmatmul.mubr.msk.f32.vlgmr.msra.gmra.mxu1 %vm292_vm0, %v1890_v0  ;;  %1658 = vmatprep.mubr.msk.f32.mxu0 %vm292_vm0, %v237_v21  ;;  %v239_v0 = vld [vmem:[%s2408_s1 + $0x18] sm:$0xff] }
  0x5d   : > { %1698 = vmatprep.mubr.msk.f32.mxu1 %vm292_vm0, %v237_v21 }
  0x5f   : > { %1659 = vmatmul.mubr.msk.f32.gmra.mxu0 %vm292_vm0, %v237_v21 }
  0x60   : > { %1699 = vmatmul.mubr.msk.f32.gmra.mxu1 %vm292_vm0, %v237_v21  ;;  %1660 = vmatprep.mubr.msk.f32.mxu0 %vm292_vm0, %v238_v22 }
  0x61   : > { %1700 = vmatprep.mubr.msk.f32.mxu1 %vm292_vm0, %v238_v22 }
  0x63   : > { %1661 = vmatmul.mubr.msk.f32.gmra.mxu0 %vm292_vm0, %v238_v22 }
  0x64   : > { %1701 = vmatmul.mubr.msk.f32.gmra.mxu1 %vm292_vm0, %v238_v22  ;;  %1662 = vmatprep.mubr.msk.f32.mxu0 %vm292_vm0, %v239_v0 }
  0x65   : > { %1702 = vmatprep.mubr.msk.f32.mxu1 %vm292_vm0, %v239_v0 }
  0x67   : > { %1663 = vmatmul.mubr.msk.f32.gmra.mxu0 %vm292_vm0, %v239_v0 }
  0x68   : > { %1703 = vmatmul.mubr.msk.f32.gmra.mxu1 %vm292_vm0, %v239_v0  ;;  %820 = vmatprep.mubr.f32.mxu0 %v2427_v23 }
  0x69   : > { %933 = vmatprep.mubr.f32.mxu1 %v2427_v23 }
  0x91   : > { %v290_v32 = vpop.permute.xlu0 %289  ;;  %v280_v37 = vpop.permute.xlu1 %279 }
  0x95   : > { %v285_v40 = vpop.permute.xlu0 %284  ;;  %v275_v55 = vpop.permute.xlu1 %274 }
 0x11b   : > { %v563_v24 = vpop.f32.mrf.mxu0 }
 0x11c   : > { %v652_v25 = vpop.f32.mrf.mxu1  ;;  %v2148_v1 = vadd.f32 %v563_v24, %v275_v55 }
 0x11d   : > { %v565_v26 = vpop.f32.mrf.mxu0  ;;  %v2150_v2 = vadd.f32 %v652_v25, %v275_v55 }
 0x11e   : > { %v654_v27 = vpop.f32.mrf.mxu1  ;;  %v2138_v60 = vadd.f32 %v565_v26, %v275_v55  ;;  %2443 = vst [vmem:[#allocation10_spill] sm:$0xff] %v2148_v1  ;;  %v2412_v11 = vmax.f32 %v2148_v1, 0.0 }
 0x11f   : > { %v569_v28 = vpop.f32.mrf.mxu0  ;;  %v2140_v61 = vadd.f32 %v654_v27, %v275_v55  ;;  %2444 = vst [vmem:[#allocation11_spill] sm:$0xff] %v2150_v2  ;;  %v2411_v12 = vmax.f32 %v2150_v2, 0.0  ;;  %v729_v55 = vpop.permute.xlu0 %728 }
 0x120   : > { %v658_v29 = vpop.f32.mrf.mxu1  ;;  %v2132_v56 = vadd.f32 %v569_v28, %v280_v37  ;;  %2441 = vst [vmem:[#allocation8_spill] sm:$0xff] %v2138_v60  ;;  %v2414_v9 = vmax.f32 %v2138_v60, 0.0 }
 0x121   : > { %v571_v30 = vpop.f32.mrf.mxu0  ;;  %v2134_v57 = vadd.f32 %v658_v29, %v280_v37  ;;  %2442 = vst [vmem:[#allocation9_spill] sm:$0xff] %v2140_v61  ;;  %v2413_v10 = vmax.f32 %v2140_v61, 0.0 }
 0x122   : > { %v660_v31 = vpop.f32.mrf.mxu1  ;;  %v2126_v51 = vadd.f32 %v571_v30, %v280_v37  ;;  %2439 = vst [vmem:[#allocation6_spill] sm:$0xff] %v2132_v56  ;;  %v2416_v7 = vmax.f32 %v2132_v56, 0.0 }
 0x123   : > { %v575_v33 = vpop.f32.mrf.mxu0  ;;  %v2128_v52 = vadd.f32 %v660_v31, %v280_v37  ;;  %2440 = vst [vmem:[#allocation7_spill] sm:$0xff] %v2134_v57  ;;  %v2415_v8 = vmax.f32 %v2134_v57, 0.0 }
 0x124   : > { %v664_v34 = vpop.f32.mrf.mxu1  ;;  %v2122_v49 = vadd.f32 %v575_v33, %v285_v40  ;;  %v2418_v5 = vmax.f32 %v2126_v51, 0.0 }
 0x125   : > { %v577_v35 = vpop.f32.mrf.mxu0  ;;  %v2124_v50 = vadd.f32 %v664_v34, %v285_v40  ;;  %2438 = vst [vmem:[#allocation5_spill] sm:$0xff] %v2128_v52  ;;  %v2417_v6 = vmax.f32 %v2128_v52, 0.0 }
 0x126   : > { %v666_v36 = vpop.f32.mrf.mxu1  ;;  %v2114_v45 = vadd.f32 %v577_v35, %v285_v40  ;;  %v2420_v3 = vmax.f32 %v2122_v49, 0.0 }
 0x127   : > { %v581_v38 = vpop.f32.mrf.mxu0  ;;  %v2116_v46 = vadd.f32 %v666_v36, %v285_v40  ;;  %v2419_v4 = vmax.f32 %v2124_v50, 0.0 }
 0x128   : > { %v670_v39 = vpop.f32.mrf.mxu1  ;;  %v2110_v41 = vadd.f32 %v581_v38, %v290_v32  ;;  %v2422_v62 = vmax.f32 %v2114_v45, 0.0 }
 0x129   : > { %v2112_v42 = vadd.f32 %v670_v39, %v290_v32  ;;  %v583_v43 = vpop.f32.mrf.mxu0  ;;  %v2421_v63 = vmax.f32 %v2116_v46, 0.0 }
 0x12a   : > { %v672_v44 = vpop.f32.mrf.mxu1  ;;  %v2118_v47 = vadd.f32 %v583_v43, %v290_v32  ;;  %v2424_v58 = vmax.f32 %v2110_v41, 0.0 }
 0x12b   : > { %v2120_v48 = vadd.f32 %v672_v44, %v290_v32  ;;  %v2423_v59 = vmax.f32 %v2112_v42, 0.0 }
 0x12c   : > { %v2426_v53 = vmax.f32 %v2118_v47, 0.0 }
 0x12d   : > { %v2425_v54 = vmax.f32 %v2120_v48, 0.0 }
 0x12e   : > { %780 = vmatprep.subr.mxu0 %v2426_v53 }
 0x12f   : > { %893 = vmatprep.subr.mxu1 %v2425_v54  ;;  %781 = vmatpush1.msra.mxu0 %v2424_v58 }
 0x130   : > { %894 = vmatpush1.msra.mxu1 %v2423_v59  ;;  %782 = vmatprep.subr.mxu0 %v2422_v62 }
 0x131   : > { %895 = vmatprep.subr.mxu1 %v2421_v63  ;;  %783 = vmatpush1.msra.mxu0 %v2420_v3 }
 0x132   : > { %896 = vmatpush1.msra.mxu1 %v2419_v4  ;;  %784 = vmatprep.subr.mxu0 %v2418_v5 }
 0x133   : > { %897 = vmatprep.subr.mxu1 %v2417_v6  ;;  %785 = vmatpush1.msra.mxu0 %v2416_v7 }
 0x134   : > { %898 = vmatpush1.msra.mxu1 %v2415_v8  ;;  %786 = vmatprep.subr.mxu0 %v2414_v9 }
 0x135   : > { %899 = vmatprep.subr.mxu1 %v2413_v10  ;;  %787 = vmatpush1.msra.mxu0 %v2412_v11 }
 0x136   : > { %900 = vmatpush1.msra.mxu1 %v2411_v12  ;;  %1590 = vmatmul.mubr.msk.f32.vlgmr.msra.gmra.mxu0 %vm731_vm1, %v240_v13 }
 0x137   : > { %1598 = vmatmul.mubr.msk.f32.vlgmr.msra.gmra.mxu1 %vm731_vm1, %v240_v13  ;;  %826 = vmatprep.mubr.f32.mxu0 %v2427_v23 }
 0x138   : > { %939 = vmatprep.mubr.f32.mxu1 %v2427_v23 }
 0x13a   : > { %1591 = vmatmul.mubr.msk.f32.gmra.mxu0 %vm731_vm1, %v241_v14 }
 0x13b   : > { %1599 = vmatmul.mubr.msk.f32.gmra.mxu1 %vm731_vm1, %v241_v14  ;;  %832 = vmatprep.mubr.f32.mxu0 %v2427_v23 }
 0x13c   : > { %945 = vmatprep.mubr.f32.mxu1 %v2427_v23 }
 0x13e   : > { %1592 = vmatmul.mubr.msk.f32.gmra.mxu0 %vm731_vm1, %v242_v15 }
 0x13f   : > { %1600 = vmatmul.mubr.msk.f32.gmra.mxu1 %vm731_vm1, %v242_v15  ;;  %838 = vmatprep.mubr.f32.mxu0 %v2427_v23  ;;  %v724_v15 = vpop.permute.xlu1 %723 }
 0x140   : > { %951 = vmatprep.mubr.f32.mxu1 %v2427_v23 }
 0x142   : > { %1593 = vmatmul.mubr.msk.f32.gmra.mxu0 %vm731_vm1, %v243_v16 }
 0x143   : > { %1601 = vmatmul.mubr.msk.f32.gmra.mxu1 %vm731_vm1, %v243_v16  ;;  %844 = vmatprep.mubr.f32.mxu0 %v2427_v23  ;;  %v714_v10 = vpop.permute.xlu1 %713 }
 0x144   : > { %957 = vmatprep.mubr.f32.mxu1 %v2427_v23 }
 0x146   : > { %1594 = vmatmul.mubr.msk.f32.gmra.mxu0 %vm731_vm1, %v244_v17 }
 0x147   : > { %1602 = vmatmul.mubr.msk.f32.gmra.mxu1 %vm731_vm1, %v244_v17  ;;  %850 = vmatprep.mubr.f32.mxu0 %v2427_v23 }
 0x148   : > { %963 = vmatprep.mubr.f32.mxu1 %v2427_v23 }
 0x14a   : > { %1595 = vmatmul.mubr.msk.f32.gmra.mxu0 %vm731_vm1, %v245_v18 }
 0x14b   : > { %1603 = vmatmul.mubr.msk.f32.gmra.mxu1 %vm731_vm1, %v245_v18  ;;  %856 = vmatprep.mubr.f32.mxu0 %v2427_v23 }
 0x14c   : > { %969 = vmatprep.mubr.f32.mxu1 %v2427_v23 }
 0x14e   : > { %1596 = vmatmul.mubr.msk.f32.gmra.mxu0 %vm731_vm1, %v246_v19 }
 0x14f   : > { %1604 = vmatmul.mubr.msk.f32.gmra.mxu1 %vm731_vm1, %v246_v19  ;;  %862 = vmatprep.mubr.f32.mxu0 %v2427_v23 }
 0x150   : > { %975 = vmatprep.mubr.f32.mxu1 %v2427_v23 }
 0x152   : > { %1597 = vmatmul.mubr.msk.f32.gmra.mxu0 %vm731_vm1, %v247_v20 }
 0x153   : > { %1605 = vmatmul.mubr.msk.f32.gmra.mxu1 %vm731_vm1, %v247_v20  ;;  %1111 = vmatprep.mubr.f32.mxu0 %v2427_v23  ;;  %v719_v20 = vpop.permute.xlu0 %718 }
 0x154   : > { %1200 = vmatprep.mubr.f32.mxu1 %v2427_v23 }
 0x157   : > { %v709_v2 = vpop.permute.xlu0 %708 }
 0x1f6   : > { %v2246_v21 = vpop.f32.mrf.mxu0 }
 0x1f7   : > { %v2248_v22 = vpop.f32.mrf.mxu1 }
 0x1f8   : > { %v2250_v0 = vpop.f32.mrf.mxu0 }
 0x1f9   : > { %v2252_v24 = vpop.f32.mrf.mxu1 }
 0x1fa   : > { %v2254_v25 = vpop.f32.mrf.mxu0 }
 0x1fb   : > { %v2256_v26 = vpop.f32.mrf.mxu1 }
 0x1fc   : > { %v2258_v27 = vpop.f32.mrf.mxu0 }
 0x1fd   : > { %v2260_v28 = vpop.f32.mrf.mxu1 }
 0x1fe   : > { %v2262_v29 = vpop.f32.mrf.mxu0 }
 0x1ff   : > { %v2264_v30 = vpop.f32.mrf.mxu1 }
 0x200   : > { %v2266_v31 = vpop.f32.mrf.mxu0 }
 0x201   : > { %v2268_v32 = vpop.f32.mrf.mxu1 }
 0x202   : > { %v840_v33 = vpop.f32.mrf.mxu0 }
 0x203   : > { %v953_v34 = vpop.f32.mrf.mxu1 }
 0x204   : > { %v842_v35 = vpop.f32.mrf.mxu0 }
 0x205   : > { %v955_v36 = vpop.f32.mrf.mxu1 }
 0x206   : > { %v846_v37 = vpop.f32.mrf.mxu0 }
 0x207   : > { %v959_v38 = vpop.f32.mrf.mxu1 }
 0x208   : > { %v848_v39 = vpop.f32.mrf.mxu0 }
 0x209   : > { %v961_v40 = vpop.f32.mrf.mxu1  ;;  %v849_v56 = vadd.f32 %v848_v39, %v714_v10 }
 0x20a   : > { %v852_v43 = vpop.f32.mrf.mxu0 }
 0x20b   : > { %v965_v44 = vpop.f32.mrf.mxu1  ;;  %v853_v1 = vadd.f32 %v852_v43, %v719_v20 }
 0x20c   : > { %v854_v13 = vpop.f32.mrf.mxu0  ;;  %v966_v61 = vadd.f32 %v965_v44, %v719_v20 }
 0x20d   : > { %v967_v14 = vpop.f32.mrf.mxu1  ;;  %v855_v58 = vadd.f32 %v854_v13, %v719_v20  ;;  %v1002_v39 = vmax.f32 %v853_v1, 0.0 }
 0x20e   : > { %v858_v16 = vpop.f32.mrf.mxu0  ;;  %v968_v54 = vadd.f32 %v967_v14, %v719_v20  ;;  %v2445_v14 = vmov 0.0  }
 0x20f   : > { %v971_v17 = vpop.f32.mrf.mxu1  ;;  %v859_v62 = vadd.f32 %v858_v16, %v724_v15  ;;  %v1003_v13 = vmax.f32 %v855_v58, 0.0  ;;  %v249_v16 = vld [vmem:[%s2408_s1 + $0x68] sm:$0xff] }
 0x210   : > { %v860_v18 = vpop.f32.mrf.mxu0  ;;  %v972_v59 = vadd.f32 %v971_v17, %v724_v15  ;;  %v1005_v43 = vmax.f32 %v968_v54, 0.0  ;;  %v250_v17 = vld [vmem:[%s2408_s1 + $0x70] sm:$0xff] }
 0x211   : > { %v973_v19 = vpop.f32.mrf.mxu1  ;;  %v861_v5 = vadd.f32 %v860_v18, %v724_v15  ;;  %v704_v18 = vpop.permute.xlu1 %703 }
 0x212   : > { %v864_v12 = vpop.f32.mrf.mxu0  ;;  %v974_v4 = vadd.f32 %v973_v19, %v724_v15  ;;  %v1008_v15 = vmax.f32 %v972_v59, 0.0  ;;  %v835_v58 = vadd.f32 %v2262_v29, %v704_v18  ;;  %v948_v54 = vadd.f32 %v2264_v30, %v704_v18  ;;  %v251_v19 = vld [vmem:[%s2408_s1 + $0x78] sm:$0xff] }
 0x213   : > { %v977_v11 = vpop.f32.mrf.mxu1  ;;  %v865_v9 = vadd.f32 %v864_v12, %v729_v55  ;;  %v962_v12 = vadd.f32 %v961_v40, %v714_v10 }
 0x214   : > { %v978_v8 = vadd.f32 %v977_v11, %v729_v55  ;;  %v866_v7 = vpop.f32.mrf.mxu0  ;;  %v1007_v11 = vmax.f32 %v861_v5, 0.0  ;;  %v1009_v52 = vmax.f32 %v974_v4, 0.0  ;;  %v1004_v5 = vmax.f32 %v966_v61, 0.0 }
 0x215   : > { %v979_v6 = vpop.f32.mrf.mxu1  ;;  %v867_v3 = vadd.f32 %v866_v7, %v729_v55  ;;  %v1010_v60 = vmax.f32 %v865_v9, 0.0  ;;  %v847_v7 = vadd.f32 %v846_v37, %v714_v10  ;;  %v954_v9 = vadd.f32 %v953_v34, %v709_v2 }
 0x216   : > { %v980_v63 = vadd.f32 %v979_v6, %v729_v55  ;;  %v1012_v57 = vmax.f32 %v978_v8, 0.0  ;;  %v960_v6 = vadd.f32 %v959_v38, %v714_v10  ;;  %v1006_v55 = vmax.f32 %v859_v62, 0.0 }
 0x217   : > { %v1011_v53 = vmax.f32 %v867_v3, 0.0  ;;  %v843_v3 = vadd.f32 %v842_v35, %v709_v2  ;;  %v841_v8 = vadd.f32 %v840_v33, %v709_v2  ;;  %v999_v62 = vmax.f32 %v849_v56, 0.0  ;;  %v694_v56 = vpop.permute.xlu1 %693 }
 0x218   : > { %v1013_v23 = vmax.f32 %v980_v63, 0.0  ;;  %v956_v63 = vadd.f32 %v955_v36, %v709_v2  ;;  %v1001_v59 = vmax.f32 %v962_v12, 0.0  ;;  %v825_v30 = vadd.f32 %v2250_v0, %v694_v56 }
 0x219   : > { %1063 = vmatprep.subr.mxu0 %v1011_v53  ;;  %v950_v53 = vadd.f32 %v2268_v32, %v704_v18  ;;  %v995_v2 = vmax.f32 %v843_v3, 0.0  ;;  %v994_v29 = vmax.f32 %v841_v8, 0.0  ;;  %v996_v32 = vmax.f32 %v954_v9, 0.0 }
 0x21a   : > { %1152 = vmatprep.subr.mxu1 %v1013_v23  ;;  %1064 = vmatpush1.msra.mxu0 %v1010_v60  ;;  %v837_v23 = vadd.f32 %v2266_v31, %v704_v18  ;;  %v1000_v60 = vmax.f32 %v960_v6, 0.0  ;;  %v997_v4 = vmax.f32 %v956_v63, 0.0  ;;  %v938_v33 = vadd.f32 %v2252_v24, %v694_v56 }
 0x21b   : > { %1153 = vmatpush1.msra.mxu1 %v1012_v57  ;;  %1065 = vmatprep.subr.mxu0 %v1007_v11  ;;  %v699_v57 = vpop.permute.xlu0 %698  ;;  %v993_v34 = vmax.f32 %v950_v53, 0.0  ;;  %v936_v35 = vadd.f32 %v2248_v22, %v694_v56  ;;  %v990_v36 = vmax.f32 %v835_v58, 0.0  ;;  %v983_v24 = vmax.f32 %v825_v30, 0.0  ;;  %v248_v22 = vld [vmem:[%s2408_s1 + $0x60] sm:$0xff]  ;;  %v1027_v63 = vpop.permute.xlu1 %1026 }
 0x21c   : > { %1154 = vmatprep.subr.mxu1 %v1009_v52  ;;  %1066 = vmatpush1.msra.mxu0 %v1006_v55  ;;  %v998_v52 = vmax.f32 %v847_v7, 0.0  ;;  %v831_v61 = vadd.f32 %v2258_v27, %v699_v57  ;;  %v944_v1 = vadd.f32 %v2260_v28, %v699_v57  ;;  %v829_v10 = vadd.f32 %v2254_v25, %v699_v57 }
 0x21d   : > { %1155 = vmatpush1.msra.mxu1 %v1008_v15  ;;  %1067 = vmatprep.subr.mxu0 %v1003_v13  ;;  %v942_v31 = vadd.f32 %v2256_v26, %v699_v57  ;;  %v991_v27 = vmax.f32 %v837_v23, 0.0  ;;  %v823_v28 = vadd.f32 %v2246_v21, %v694_v56  ;;  %v992_v25 = vmax.f32 %v948_v54, 0.0 }
 0x21e   : > { %1156 = vmatprep.subr.mxu1 %v1005_v43  ;;  %1068 = vmatpush1.msra.mxu0 %v1002_v39  ;;  %v987_v26 = vmax.f32 %v831_v61, 0.0  ;;  %v989_v37 = vmax.f32 %v944_v1, 0.0  ;;  %v986_v38 = vmax.f32 %v829_v10, 0.0  ;;  %v985_v40 = vmax.f32 %v938_v33, 0.0 }
 0x21f   : > { %1157 = vmatpush1.msra.mxu1 %v1004_v5  ;;  %1069 = vmatprep.subr.mxu0 %v999_v62  ;;  %v988_v0 = vmax.f32 %v942_v31, 0.0  ;;  %v982_v44 = vmax.f32 %v823_v28, 0.0  ;;  %v984_v21 = vmax.f32 %v936_v35, 0.0  ;;  %v1032_v3 = vpop.permute.xlu0 %1031  ;;  %v1017_v53 = vpop.permute.xlu1 %1016 }
 0x220   : > { %1158 = vmatprep.subr.mxu1 %v1001_v59  ;;  %1070 = vmatpush1.msra.mxu0 %v998_v52 }
 0x221   : > { %1159 = vmatpush1.msra.mxu1 %v1000_v60  ;;  %1071 = vmatprep.subr.mxu0 %v995_v2 }
 0x222   : > { %1160 = vmatprep.subr.mxu1 %v997_v4  ;;  %1072 = vmatpush1.msra.mxu0 %v994_v29 }
 0x223   : > { %1161 = vmatpush1.msra.mxu1 %v996_v32  ;;  %1073 = vmatprep.subr.mxu0 %v991_v27  ;;  %v1022_v23 = vpop.permute.xlu0 %1021 }
 0x224   : > { %1162 = vmatprep.subr.mxu1 %v993_v34  ;;  %1074 = vmatpush1.msra.mxu0 %v990_v36 }
 0x225   : > { %1163 = vmatpush1.msra.mxu1 %v992_v25  ;;  %1075 = vmatprep.subr.mxu0 %v987_v26 }
 0x226   : > { %1164 = vmatprep.subr.mxu1 %v989_v37  ;;  %1076 = vmatpush1.msra.mxu0 %v986_v38 }
 0x227   : > { %1165 = vmatpush1.msra.mxu1 %v988_v0  ;;  %1077 = vmatprep.subr.mxu0 %v983_v24  ;;  %v2446_v24 = vmax.f32 %v2118_v47, 0.0 }
 0x228   : > { %1166 = vmatprep.subr.mxu1 %v985_v40  ;;  %1078 = vmatpush1.msra.mxu0 %v982_v44  ;;  %v2447_v44 = vmax.f32 %v2120_v48, 0.0 }
 0x229   : > { %1167 = vmatpush1.msra.mxu1 %v984_v21  ;;  %1606 = vmatmul.mubr.msk.f32.vlgmr.msra.gmra.mxu0 %vm1034_vm2, %v248_v22 }
 0x22a   : > { %1610 = vmatmul.mubr.msk.f32.vlgmr.msra.gmra.mxu1 %vm1034_vm2, %v248_v22  ;;  %1117 = vmatprep.mubr.f32.mxu0 %v2445_v14 }
 0x22b   : > { %1206 = vmatprep.mubr.f32.mxu1 %v2445_v14 }
 0x22d   : > { %1607 = vmatmul.mubr.msk.f32.gmra.mxu0 %vm1034_vm2, %v249_v16 }
 0x22e   : > { %1611 = vmatmul.mubr.msk.f32.gmra.mxu1 %vm1034_vm2, %v249_v16  ;;  %1123 = vmatprep.mubr.f32.mxu0 %v2445_v14 }
 0x22f   : > { %1212 = vmatprep.mubr.f32.mxu1 %v2445_v14 }
 0x231   : > { %1608 = vmatmul.mubr.msk.f32.gmra.mxu0 %vm1034_vm2, %v250_v17 }
 0x232   : > { %1612 = vmatmul.mubr.msk.f32.gmra.mxu1 %vm1034_vm2, %v250_v17  ;;  %1129 = vmatprep.mubr.f32.mxu0 %v2445_v14  ;;  %v2448_v17 = vmax.f32 %v2110_v41, 0.0  ;;  %v2453_v41 = vmax.f32 %v2124_v50, 0.0  ;;  %v2461_v50 = vld [vmem:[#allocation8_spill] sm:$0xff] }
 0x233   : > { %1218 = vmatprep.mubr.f32.mxu1 %v2445_v14 }
 0x235   : > { %1609 = vmatmul.mubr.msk.f32.gmra.mxu0 %vm1034_vm2, %v251_v19 }
 0x236   : > { %1613 = vmatmul.mubr.msk.f32.gmra.mxu1 %vm1034_vm2, %v251_v19  ;;  %1337 = vmatprep.mubr.f32.mxu0 %v2445_v14 }
 0x237   : > { %1414 = vmatprep.mubr.f32.mxu1 %v2445_v14 }
 0x2e9   : > { %v1113_v20 = vpop.f32.mrf.mxu0 }
 0x2ea   : > { %v1202_v12 = vpop.f32.mrf.mxu1  ;;  %v1114_v36 = vadd.f32 %v1113_v20, %v1017_v53 }
 0x2eb   : > { %v1115_v11 = vpop.f32.mrf.mxu0  ;;  %v1203_v25 = vadd.f32 %v1202_v12, %v1017_v53 }
 0x2ec   : > { %v1204_v18 = vpop.f32.mrf.mxu1  ;;  %v1116_v54 = vadd.f32 %v1115_v11, %v1017_v53  ;;  %v2449_v11 = vmax.f32 %v2112_v42, 0.0  ;;  %v1225_v48 = vmax.f32 %v1114_v36, 0.0  ;;  %v2454_v42 = vmax.f32 %v2126_v51, 0.0 }
 0x2ed   : > { %v1119_v7 = vpop.f32.mrf.mxu0  ;;  %v1205_v52 = vadd.f32 %v1204_v18, %v1017_v53 }
 0x2ee   : > { %v1208_v6 = vpop.f32.mrf.mxu1  ;;  %v1120_v29 = vadd.f32 %v1119_v7, %v1022_v23  ;;  %v1226_v20 = vmax.f32 %v1116_v54, 0.0  ;;  %v2450_v7 = vmax.f32 %v2114_v45, 0.0  ;;  %v2455_v45 = vld [vmem:[#allocation5_spill] sm:$0xff]  ;;  %v2465_v54 = vld [vmem:[#allocation10_spill] sm:$0xff] }
 0x2ef   : > { %v1121_v55 = vpop.f32.mrf.mxu0  ;;  %v1209_v32 = vadd.f32 %v1208_v6, %v1022_v23  ;;  %v1228_v12 = vmax.f32 %v1205_v52, 0.0  ;;  %v2466_v52 = vmax.f32 %v2465_v54, 0.0 }
 0x2f0   : > { %v1210_v15 = vpop.f32.mrf.mxu1  ;;  %v1122_v4 = vadd.f32 %v1121_v55, %v1022_v23  ;;  %v1229_v22 = vmax.f32 %v1120_v29, 0.0  ;;  %v2451_v55 = vmax.f32 %v2116_v46, 0.0  ;;  %v2457_v46 = vld [vmem:[#allocation6_spill] sm:$0xff] }
 0x2f1   : > { %v1125_v13 = vpop.f32.mrf.mxu0  ;;  %v1211_v56 = vadd.f32 %v1210_v15, %v1022_v23  ;;  %v1231_v16 = vmax.f32 %v1209_v32, 0.0  ;;  %v1227_v15 = vmax.f32 %v1203_v25, 0.0  ;;  %v2459_v23 = vld [vmem:[#allocation7_spill] sm:$0xff] }
 0x2f2   : > { %v1214_v43 = vpop.f32.mrf.mxu1  ;;  %v1126_v60 = vadd.f32 %v1125_v13, %v1027_v63  ;;  %v1230_v38 = vmax.f32 %v1122_v4, 0.0  ;;  %v2460_v53 = vmax.f32 %v2459_v23, 0.0  ;;  %v252_v4 = vld [vmem:[%s2408_s1 + $0x80] sm:$0xff] }
 0x2f3   : > { %v1127_v8 = vpop.f32.mrf.mxu0  ;;  %v1215_v61 = vadd.f32 %v1214_v43, %v1027_v63  ;;  %v1232_v0 = vmax.f32 %v1211_v56, 0.0  ;;  %v253_v56 = vld [vmem:[%s2408_s1 + $0x88] sm:$0xff] }
 0x2f4   : > { %v1216_v9 = vpop.f32.mrf.mxu1  ;;  %v1128_v62 = vadd.f32 %v1127_v8, %v1027_v63  ;;  %v1233_v26 = vmax.f32 %v1126_v60, 0.0  ;;  %v1246_v43 = vadd.f32 %v1230_v38, %v2454_v42  ;;  %v2456_v8 = vmax.f32 %v2455_v45, 0.0 }
 0x2f5   : > { %v1131_v39 = vpop.f32.mrf.mxu0  ;;  %v1217_v59 = vadd.f32 %v1216_v9, %v1027_v63  ;;  %v1235_v37 = vmax.f32 %v1215_v61, 0.0  ;;  %v1241_v60 = vadd.f32 %v1225_v48, %v2466_v52  ;;  %v2467_v61 = vld [vmem:[#allocation11_spill] sm:$0xff] }
 0x2f6   : > { %v1220_v5 = vpop.f32.mrf.mxu1  ;;  %v1132_v57 = vadd.f32 %v1131_v39, %v1032_v3  ;;  %v1234_v27 = vmax.f32 %v1128_v62, 0.0  ;;  %v1248_v9 = vadd.f32 %v1232_v0, %v2456_v8  ;;  %v2458_v39 = vmax.f32 %v2457_v46, 0.0 }
 0x2f7   : > { %v1221_v58 = vadd.f32 %v1220_v5, %v1032_v3  ;;  %v1133_v1 = vpop.f32.mrf.mxu0  ;;  %v1236_v34 = vmax.f32 %v1217_v59, 0.0  ;;  %v1251_v13 = vadd.f32 %v1235_v37, %v2453_v41  ;;  %v2462_v62 = vmax.f32 %v2461_v50, 0.0 }
 0x2f8   : > { %v1222_v2 = vpop.f32.mrf.mxu1  ;;  %v1134_v10 = vadd.f32 %v1133_v1, %v1032_v3  ;;  %v1237_v30 = vmax.f32 %v1132_v57, 0.0  ;;  %v1250_v6 = vadd.f32 %v1234_v27, %v2450_v7  ;;  %v1245_v5 = vadd.f32 %v1229_v22, %v2458_v39  ;;  %v2463_v57 = vld [vmem:[#allocation9_spill] sm:$0xff]  ;;  %v1265_v27 = vpop.permute.xlu1 %1264 }
 0x2f9   : > { %v1223_v31 = vadd.f32 %v1222_v2, %v1032_v3  ;;  %v1239_v33 = vmax.f32 %v1221_v58, 0.0  ;;  %v1252_v47 = vadd.f32 %v1236_v34, %v2451_v55  ;;  %v2452_v3 = vmax.f32 %v2122_v49, 0.0 }
 0x2fa   : > { %v1238_v28 = vmax.f32 %v1134_v10, 0.0  ;;  %v1253_v19 = vadd.f32 %v1237_v30, %v2448_v17  ;;  %v1247_v49 = vadd.f32 %v1231_v16, %v2460_v53  ;;  %v1242_v59 = vadd.f32 %v1226_v20, %v2462_v62  ;;  %v1260_v10 = vpop.permute.xlu0 %1259 }
 0x2fb   : > { %v1240_v35 = vmax.f32 %v1223_v31, 0.0  ;;  %v1255_v18 = vadd.f32 %v1239_v33, %v2449_v11  ;;  %v1249_v63 = vadd.f32 %v1233_v26, %v2452_v3  ;;  %v2464_v58 = vmax.f32 %v2463_v57, 0.0 }
 0x2fc   : > { %v1254_v40 = vadd.f32 %v1238_v28, %v2446_v24  ;;  %v2468_v1 = vmax.f32 %v2467_v61, 0.0 }
 0x2fd   : > { %v1256_v21 = vadd.f32 %v1240_v35, %v2447_v44  ;;  %v1244_v51 = vadd.f32 %v1228_v12, %v2464_v58 }
 0x2fe   : > { %1297 = vmatprep.subr.mxu0 %v1254_v40  ;;  %v1243_v2 = vadd.f32 %v1227_v15, %v2468_v1 }
 0x2ff   : > { %1374 = vmatprep.subr.mxu1 %v1256_v21  ;;  %1298 = vmatpush1.msra.mxu0 %v1253_v19 }
 0x300   : > { %1375 = vmatpush1.msra.mxu1 %v1255_v18  ;;  %1299 = vmatprep.subr.mxu0 %v1250_v6 }
 0x301   : > { %1376 = vmatprep.subr.mxu1 %v1252_v47  ;;  %1300 = vmatpush1.msra.mxu0 %v1249_v63 }
 0x302   : > { %1377 = vmatpush1.msra.mxu1 %v1251_v13  ;;  %1301 = vmatprep.subr.mxu0 %v1246_v43 }
 0x303   : > { %1378 = vmatprep.subr.mxu1 %v1248_v9  ;;  %1302 = vmatpush1.msra.mxu0 %v1245_v5 }
 0x304   : > { %1379 = vmatpush1.msra.mxu1 %v1247_v49  ;;  %1303 = vmatprep.subr.mxu0 %v1242_v59 }
 0x305   : > { %1380 = vmatprep.subr.mxu1 %v1244_v51  ;;  %1304 = vmatpush1.msra.mxu0 %v1241_v60 }
 0x306   : > { %1381 = vmatpush1.msra.mxu1 %v1243_v2  ;;  %1614 = vmatmul.mubr.msk.f32.vlgmr.msra.gmra.mxu0 %vm731_vm1, %v252_v4 }
 0x307   : > { %1616 = vmatmul.mubr.msk.f32.vlgmr.msra.gmra.mxu1 %vm731_vm1, %v252_v4  ;;  %1343 = vmatprep.mubr.f32.mxu0 %v2445_v14 }
 0x308   : > { %1420 = vmatprep.mubr.f32.mxu1 %v2445_v14 }
 0x30a   : > { %1615 = vmatmul.mubr.msk.f32.gmra.mxu0 %vm731_vm1, %v253_v56 }
 0x30b   : > { %1617 = vmatmul.mubr.msk.f32.gmra.mxu1 %vm731_vm1, %v253_v56 }
 0x3c6   : > { %v1339_v31 = vpop.f32.mrf.mxu0 }
 0x3c7   : > { %v1416_v29 = vpop.f32.mrf.mxu1  ;;  %v1340_v32 = vadd.f32 %v1339_v31, %v1260_v10 }
 0x3c8   : > { %v1417_v30 = vadd.f32 %v1416_v29, %v1260_v10  ;;  %v1341_v14 = vpop.f32.mrf.mxu0 }
 0x3c9   : > { %v1418_v33 = vpop.f32.mrf.mxu1  ;;  %1427 = vst [vmem:[%s164_s5] sm:$0xff] %v1340_v32  ;;  %v1342_v34 = vadd.f32 %v1341_v14, %v1260_v10 }
 0x3ca   : > { %1429 = vst [vmem:[%s164_s5 + $0x10] sm:$0xff] %v1417_v30  ;;  %v1419_v28 = vadd.f32 %v1418_v33, %v1260_v10  ;;  %v1345_v35 = vpop.f32.mrf.mxu0 }
 0x3cb   : > { %v1422_v36 = vpop.f32.mrf.mxu1  ;;  %1428 = vst [vmem:[%s164_s5 + $0x8] sm:$0xff] %v1342_v34  ;;  %v1346_v25 = vadd.f32 %v1345_v35, %v1265_v27 }
 0x3cc   : > { %1430 = vst [vmem:[%s164_s5 + $0x18] sm:$0xff] %v1419_v28  ;;  %v1423_v26 = vadd.f32 %v1422_v36, %v1265_v27  ;;  %v1347_v37 = vpop.f32.mrf.mxu0 }
 0x3cd   : > { %v1424_v38 = vpop.f32.mrf.mxu1  ;;  %1431 = vst [vmem:[%s164_s5 + $0x20] sm:$0xff] %v1346_v25  ;;  %v1348_v0 = vadd.f32 %v1347_v37, %v1265_v27 }
 0x3ce   : > { %1433 = vst [vmem:[%s164_s5 + $0x30] sm:$0xff] %v1423_v26  ;;  %v1425_v24 = vadd.f32 %v1424_v38, %v1265_v27 }
 0x3cf   : > { %1432 = vst [vmem:[%s164_s5 + $0x28] sm:$0xff] %v1348_v0 }
 0x3d0   : > { %1434 = vst [vmem:[%s164_s5 + $0x38] sm:$0xff] %v1425_v24 }
 0x3d1   : > { %1763 = shalt.err (!%p1760_p3)
}
 0x3d2   : > { %s1764_s25 = scalar_lea.hbm %s2363_s9, 1024  ;;  %s1768_s27 = scalar_lea.hbm %s2410_s3, 2048 }
 0x3d3   : > { %p1765_p4 = scmp.ne.s32.totalorder %s2363_s9, %s1764_s25  ;;  %p1769_p9 = scmp.lt.s32.totalorder %s2363_s9, %s2410_s3 }
 0x3d4   : > { %p1770_p10 = scmp.lt.s32.totalorder %s1768_s27, %s1764_s25 }
 0x3d5   : > { %p1766_p7 = pnand %p1765_p4, %p1876_p5 }
 0x3d6   : > { %p1771_p11 = por %p1770_p10, %p1769_p9 }
 0x3d7   : > { %p1767_p8 = pneg %p1766_p7 }
 0x3d9   : > { %p1772_p12 = pnand %p1771_p11, %p1767_p8 }
 0x3db   : > { %1775 = shalt.err (!%p1772_p12)
}
 0x3dc   : > { %s1815_s30 = smov 512   ;;  %s1816_s4 = smov 1024  }
 0x3dd   : > { %s1817_s5 = smov 32  }
 0x3de   : > { %1704 = dma.vmem_to_hbm [thread:$0]  (%p1876_p5), %s2358_s6, 1024, %s2363_s9, %s2367_s16, %s1815_s30, %s1816_s4, %s1817_s5  }
 0x3df PF: > { %p1710_p13 = scmp.ge.s32.totalorder %s1810_s15, 2  ;;  %s1464_s7 = sand.u32 1, %s1798_s12  }
 0x3e0   : > { %s1465_s11 = scalar_lea.sflag [#allocation3], %s1464_s7 }
 0x3e1   : > { %p1707_p0 = pnand %p1710_p13, %p1880_p6 }
 0x3e3   : > { %p1708_p1 = pneg %p1707_p0 }
 0x3e5   : > { %1793 = dma.done.wait (%p1708_p1), %s1465_s11, 1024  }
 0x3e6   : > { %1795 = vsyncadd (%p1708_p1), %s1465_s11, 4294966272  ;;  %p13_p2 = scmp.ge.s32.totalorder %s1863_s18, 4   ;;  %s2469_s12 = smov %s1802_s13 }
 0x3e7   : > { %s2470_s13 = smov %s1806_s14  ;;  %s2471_s14 = smov %s1874_s21 }
 0x3e8   : > { %s2472_s15 = smov %s1863_s18  ;;  %15 = sbr.rel (!%p13_p2) target bundleno = 3 (0x3), region = 67 }
 0x3ed   :  { %1470 = vsyncpa [#allocation3], 1 }
 0x3ee   :  { %1472 = vsyncpa [#allocation3 + $0x1], 1 }

</bundles_post_ra>
